<compile_context>
chip_gen: v6e
topology: v6e:2x2x1
jax: 0.10.0
libtpu: 0.0.40
codegen_flags: <defaults>
</compile_context>

<pallas_src>
import functools

import jax
import jax.numpy as jnp
from jax import lax
from jax.experimental import pallas as pl
from jax.experimental.pallas import tpu as pltpu


def _round_up(x, m):
    return (x + m - 1) // m * m


# ----------------------------- Pallas kernel --------------------------------

def _conv_tap_kernel(xt_ref, w_ref, b_ref, o_ref, *, nb, Ho, Wo):
    # xt_ref: (2, nb, (Ho+1)*Wo, 3*Cin)  H-phase-major compact tap layout
    #         xt[ph, b, hq*Wo + wo, kw*Cin + ci] = xpad[b, 2*hq + ph, 2*wo + kw, ci]
    # w_ref : (3, 3*Cin, Cout_pad)       per-kernel-row weight slabs
    # b_ref : (1, Cout_pad)
    # o_ref : (nb, Ho*Wo, Cout_pad)
    Mo = Ho * Wo
    Cp = o_ref.shape[-1]
    K3 = xt_ref.shape[-1]

    acc = jnp.zeros((nb * Mo, Cp), jnp.float32)
    for kh in range(3):                       # static unroll: 3 MXU GEMMs/step
        ph, dh = kh % 2, kh // 2
        lhs = xt_ref[ph, :, dh * Wo:dh * Wo + Mo, :]          # (nb, Mo, 3*Cin)
        lhs = lhs.reshape(nb * Mo, K3)        # images flattened into GEMM rows
        acc = acc + jnp.dot(lhs, w_ref[kh],
                            preferred_element_type=jnp.float32)
    out = acc + b_ref[...]
    o_ref[...] = out.reshape(nb, Mo, Cp).astype(o_ref.dtype)


def _pick_nb(N, rows_per_image, max_rows=2048, max_nb=16):
    """Images per grid step: big enough GEMMs, but keep >=2 grid steps if N>=2."""
    best = 1
    for cand in range(1, N + 1):
        if N % cand or cand > max_nb:
            continue
        if cand > 1 and cand * rows_per_image > max_rows:
            continue
        if N >= 2 and N // cand < 2:
            continue
        best = cand
    return best


# ------------------------------ Module wrapper -------------------------------

class Downsample:
    """JAX/Pallas port of PyTorch Downsample (Conv2d 3x3, stride=2, padding=1)."""

    def __init__(self, in_channels, out_channels, key):
        self.in_channels = in_channels
        self.out_channels = out_channels
        kw_key, b_key = jax.random.split(key)
        # PyTorch Conv2d default init: U(-bound, bound), bound = 1/sqrt(fan_in)
        fan_in = in_channels * 9
        bound = 1.0 / (fan_in ** 0.5)
        self.weight = jax.random.uniform(
            kw_key, (out_channels, in_channels, 3, 3),
            minval=-bound, maxval=bound, dtype=jnp.float32)
        self.bias = jax.random.uniform(
            b_key, (out_channels,), minval=-bound, maxval=bound,
            dtype=jnp.float32)

    def __call__(self, x):
        # x: [N, Cin, H, W]  (NCHW, same as PyTorch)
        N, Cin, H, W = x.shape
        assert Cin == self.in_channels
        Cout = self.out_channels
        Ho, Wo = (H + 1) // 2, (W + 1) // 2        # k=3, s=2, p=1
        Hq = Ho + 1
        K3 = 3 * Cin
        Cp = _round_up(Cout, 128)                  # lane-dense output channels

        # ---- glue (single fused XLA pass): NHWC + pad + compact tap layout.
        xh = jnp.transpose(x, (0, 2, 3, 1))                        # NHWC
        xp = jnp.pad(xh, ((0, 0),
                          (1, 2 * Ho + 1 - H),
                          (1, 2 * Wo - W),
                          (0, 0)))
        # width taps concatenated on the channel (lane) axis: (N, Hp, Wo, 3*Cin)
        cols = [xp[:, :, kw:kw + 2 * Wo - 1:2, :] for kw in range(3)]
        xw = jnp.concatenate(cols, axis=-1)
        # split row phases and flatten (hq, wo) -> rows: (2, N, Hq*Wo, 3*Cin)
        xt = jnp.stack([xw[:, ph:ph + 2 * Hq:2, :, :] for ph in (0, 1)], axis=0)
        xt = xt.reshape(2, N, Hq * Wo, K3)

        # Weight (Cout, Cin, 3, 3) -> (kh, kw*Cin + ci, Cout), Cout padded to Cp.
        w_t = jnp.transpose(self.weight, (2, 3, 1, 0)).reshape(3, K3, Cout)
        w_t = jnp.pad(w_t, ((0, 0), (0, 0), (0, Cp - Cout)))
        b_row = jnp.pad(self.bias, (0, Cp - Cout)).reshape(1, Cp)

        # ---- Pallas hot path: batched tap-GEMMs + bias.
        nb = _pick_nb(N, Ho * Wo)
        grid = (N // nb,)
        kernel = functools.partial(_conv_tap_kernel, nb=nb, Ho=Ho, Wo=Wo)

        itemsize = jnp.dtype(x.dtype).itemsize
        est = (2 * (2 * nb * Hq * Wo * K3 + nb * Ho * Wo * Cp) * itemsize
               + 2 * (3 * K3 * Cp + Cp) * 4
               + nb * Ho * Wo * Cp * 4)
        vmem_limit = int(min(64 * 2 ** 20, max(32 * 2 ** 20, 4 * est)))

        out_flat = pl.pallas_call(
            kernel,
            out_shape=jax.ShapeDtypeStruct((N, Ho * Wo, Cp), x.dtype),
            grid_spec=pltpu.PrefetchScalarGridSpec(
                num_scalar_prefetch=0,
                grid=grid,
                in_specs=[
                    pl.BlockSpec((2, nb, Hq * Wo, K3), lambda i: (0, i, 0, 0)),
                    pl.BlockSpec((3, K3, Cp), lambda i: (0, 0, 0)),
                    pl.BlockSpec((1, Cp), lambda i: (0, 0)),
                ],
                out_specs=pl.BlockSpec((nb, Ho * Wo, Cp), lambda i: (i, 0, 0)),
            ),
            compiler_params=pltpu.CompilerParams(
                dimension_semantics=("parallel",),
                vmem_limit_bytes=vmem_limit),
        )(xt, w_t, b_row)

        # ---- glue: drop Cout padding, back to NCHW.
        out = out_flat[:, :, :Cout].reshape(N, Ho, Wo, Cout)
        return jnp.transpose(out, (0, 3, 1, 2))                    # [N,Cout,Ho,Wo]


# ---------------------------------- main -------------------------------------

if __name__ == "__main__":
    key = jax.random.PRNGKey(0)
    k_x, k_params = jax.random.split(key)

    N, Cin, Cout, H, W = 2, 4, 8, 16, 16
    x = jax.random.normal(k_x, (N, Cin, H, W), dtype=jnp.float32)

    mod = Downsample(Cin, Cout, k_params)
    y = jax.block_until_ready(mod(x))

    # Reference: XLA's native conv with the same weights (NCHW / OIHW).
    y_ref = lax.conv_general_dilated(
        x, mod.weight, window_strides=(2, 2), padding=((1, 1), (1, 1)),
        dimension_numbers=("NCHW", "OIHW", "NCHW"))
    y_ref = y_ref + mod.bias.reshape(1, Cout, 1, 1)

    assert y.shape == (N, Cout, H // 2, W // 2), y.shape
    err = float(jnp.max(jnp.abs(y - y_ref)))
    assert err < 1e-4, err

    print("KERNEL_OK")
</pallas_src>

<mosaic_0001>
module attributes {stable_mosaic.version = 11 : i64} {
  func.func @_conv_tap_kernel(%arg0: i32, %arg1: memref<2x1x72x12xf32, #tpu.memory_space<vmem>>, %arg2: memref<3x12x128xf32, #tpu.memory_space<vmem>>, %arg3: memref<1x128xf32, #tpu.memory_space<vmem>>, %arg4: memref<1x64x128xf32, #tpu.memory_space<vmem>>) attributes {dimension_semantics = [#tpu.dimension_semantics<parallel>], iteration_bounds = array<i64: 2>, scalar_prefetch = 0 : i64, scratch_operands = 0 : i64, tpu.core_type = #tpu.core_type<tc>, window_params = [{transform_indices = @transform_0, window_bounds = array<i64: 2, 1, 72, 12>}, {pipeline_mode = #tpu.pipeline_mode<synchronous>, transform_indices = @transform_1, window_bounds = array<i64: 3, 12, 128>}, {pipeline_mode = #tpu.pipeline_mode<synchronous>, transform_indices = @transform_2, window_bounds = array<i64: 1, 128>}, {transform_indices = @transform_3, window_bounds = array<i64: 1, 64, 128>}]} {
    %cst = arith.constant 0.000000e+00 : f32
    %0 = vector.broadcast %cst : f32 to vector<64x128xf32>
    %c0 = arith.constant 0 : index
    %c0_0 = arith.constant 0 : index
    %c0_1 = arith.constant 0 : index
    %c0_2 = arith.constant 0 : index
    %1 = vector.load %arg1[%c0, %c0_0, %c0_1, %c0_2] : memref<2x1x72x12xf32, #tpu.memory_space<vmem>>, vector<1x1x64x12xf32>
    %2 = vector.shape_cast %1 : vector<1x1x64x12xf32> to vector<1x64x12xf32>
    %3 = vector.shape_cast %2 : vector<1x64x12xf32> to vector<64x12xf32>
    %c0_3 = arith.constant 0 : index
    %c0_4 = arith.constant 0 : index
    %c0_5 = arith.constant 0 : index
    %4 = vector.load %arg2[%c0_3, %c0_4, %c0_5] : memref<3x12x128xf32, #tpu.memory_space<vmem>>, vector<1x12x128xf32>
    %5 = vector.shape_cast %4 : vector<1x12x128xf32> to vector<12x128xf32>
    %cst_6 = arith.constant dense<0.000000e+00> : vector<64x128xf32>
    %6 = tpu.matmul %3, %5, %cst_6 {dimension_numbers = #tpu.dot_dimension_numbers<[1], [0], [0], [1], [0, 0, 1, 1], [], []>} : vector<64x12xf32>, vector<12x128xf32>, vector<64x128xf32> -> vector<64x128xf32>
    %7 = arith.addf %0, %6 : vector<64x128xf32>
    %c1 = arith.constant 1 : index
    %c0_7 = arith.constant 0 : index
    %c0_8 = arith.constant 0 : index
    %c0_9 = arith.constant 0 : index
    %8 = vector.load %arg1[%c1, %c0_7, %c0_8, %c0_9] : memref<2x1x72x12xf32, #tpu.memory_space<vmem>>, vector<1x1x64x12xf32>
    %9 = vector.shape_cast %8 : vector<1x1x64x12xf32> to vector<1x64x12xf32>
    %10 = vector.shape_cast %9 : vector<1x64x12xf32> to vector<64x12xf32>
    %c1_10 = arith.constant 1 : index
    %c0_11 = arith.constant 0 : index
    %c0_12 = arith.constant 0 : index
    %11 = vector.load %arg2[%c1_10, %c0_11, %c0_12] : memref<3x12x128xf32, #tpu.memory_space<vmem>>, vector<1x12x128xf32>
    %12 = vector.shape_cast %11 : vector<1x12x128xf32> to vector<12x128xf32>
    %cst_13 = arith.constant dense<0.000000e+00> : vector<64x128xf32>
    %13 = tpu.matmul %10, %12, %cst_13 {dimension_numbers = #tpu.dot_dimension_numbers<[1], [0], [0], [1], [0, 0, 1, 1], [], []>} : vector<64x12xf32>, vector<12x128xf32>, vector<64x128xf32> -> vector<64x128xf32>
    %14 = arith.addf %7, %13 : vector<64x128xf32>
    %c0_14 = arith.constant 0 : index
    %c0_15 = arith.constant 0 : index
    %c8 = arith.constant 8 : index
    %c0_16 = arith.constant 0 : index
    %15 = vector.load %arg1[%c0_14, %c0_15, %c8, %c0_16] : memref<2x1x72x12xf32, #tpu.memory_space<vmem>>, vector<1x1x64x12xf32>
    %16 = vector.shape_cast %15 : vector<1x1x64x12xf32> to vector<1x64x12xf32>
    %17 = vector.shape_cast %16 : vector<1x64x12xf32> to vector<64x12xf32>
    %c2 = arith.constant 2 : index
    %c0_17 = arith.constant 0 : index
    %c0_18 = arith.constant 0 : index
    %18 = vector.load %arg2[%c2, %c0_17, %c0_18] : memref<3x12x128xf32, #tpu.memory_space<vmem>>, vector<1x12x128xf32>
    %19 = vector.shape_cast %18 : vector<1x12x128xf32> to vector<12x128xf32>
    %cst_19 = arith.constant dense<0.000000e+00> : vector<64x128xf32>
    %20 = tpu.matmul %17, %19, %cst_19 {dimension_numbers = #tpu.dot_dimension_numbers<[1], [0], [0], [1], [0, 0, 1, 1], [], []>} : vector<64x12xf32>, vector<12x128xf32>, vector<64x128xf32> -> vector<64x128xf32>
    %21 = arith.addf %14, %20 : vector<64x128xf32>
    %c0_20 = arith.constant 0 : index
    %c0_21 = arith.constant 0 : index
    %22 = vector.load %arg3[%c0_20, %c0_21] : memref<1x128xf32, #tpu.memory_space<vmem>>, vector<1x128xf32>
    %23 = vector.broadcast %22 : vector<1x128xf32> to vector<64x128xf32>
    %24 = arith.addf %21, %23 : vector<64x128xf32>
    %25 = vector.shape_cast %24 : vector<64x128xf32> to vector<1x64x128xf32>
    %c0_22 = arith.constant 0 : index
    %c0_23 = arith.constant 0 : index
    %c0_24 = arith.constant 0 : index
    %26 = vector.load %arg4[%c0_22, %c0_23, %c0_24] : memref<1x64x128xf32, #tpu.memory_space<vmem>>, vector<1x64x128xf32>
    tpu.vector_store %arg4[%c0_22, %c0_23, %c0_24], %25 {strides = array<i32>} : memref<1x64x128xf32, #tpu.memory_space<vmem>>, vector<1x64x128xf32>,
    return
  }
  func.func @transform_0(%arg0: i32) -> (i32, i32, i32, i32) {
    %c0_i32 = arith.constant 0 : i32
    %c0_i32_0 = arith.constant 0 : i32
    %c0_i32_1 = arith.constant 0 : i32
    %c0_i32_2 = arith.constant 0 : i32
    return %c0_i32, %arg0, %c0_i32_0, %c0_i32_1 : i32, i32, i32, i32
  }
  func.func @transform_1(%arg0: i32) -> (i32, i32, i32) {
    %c0_i32 = arith.constant 0 : i32
    %c0_i32_0 = arith.constant 0 : i32
    %c0_i32_1 = arith.constant 0 : i32
    %c0_i32_2 = arith.constant 0 : i32
    return %c0_i32, %c0_i32_0, %c0_i32_1 : i32, i32, i32
  }
  func.func @transform_2(%arg0: i32) -> (i32, i32) {
    %c0_i32 = arith.constant 0 : i32
    %c0_i32_0 = arith.constant 0 : i32
    %c0_i32_1 = arith.constant 0 : i32
    return %c0_i32, %c0_i32_0 : i32, i32
  }
  func.func @transform_3(%arg0: i32) -> (i32, i32, i32) {
    %c0_i32 = arith.constant 0 : i32
    %c0_i32_0 = arith.constant 0 : i32
    %c0_i32_1 = arith.constant 0 : i32
    return %arg0, %c0_i32, %c0_i32_0 : i32, i32, i32
  }
}

</mosaic_0001>

<bundles_post_ra>
// kernel: tpu_custom_call.1
= control target key start
LH: loop header
LB: loop body
LE: loop exit
PB: predicated region body
PF: predicated region fallthrough
CT: control target
= control target key end

     0   :  { %8 = vsyncpa [#allocation4], 0  ;;  %s1314_s0 = inlined_call_operand.vmem [shape: f32[2,2,72,12], index: 0, kind: input, shape index: {}]   ;;  %s1315_s1 = inlined_call_operand.vmem [shape: f32[3,12,128], index: 1, kind: input, shape index: {}]   ;;  %s1316_s2 = inlined_call_operand.vmem [shape: f32[1,128], index: 2, kind: input, shape index: {}]   ;;  %s1317_s3 = inlined_call_operand.hbm [shape: f32[2,64,128], index: 3, kind: output, shape index: {}]  }
   0x1   :  { %10 = vsyncpa [#allocation4 + $0x1], 0  ;;  %s1080_s12 = smov 0   ;;  %s1082_s13 = smov 0  }
   0x2   :  { %s1084_s14 = smov 0   ;;  %s1086_s15 = smov 0  }
   0x3 LB: > { %s816_s16 = sadd.s32 4294967295, %s1055_s15   ;;  %s817_s17 = sadd.s32 4294967294, %s1055_s15   ;;  %s1055_s15 = sphi %s1086_s15, %s1323_s15   ;;  %s1051_s14 = sphi %s1084_s14, %s1322_s14   ;;  %s1047_s13 = sphi %s1082_s13, %s1321_s13   ;;  %s1043_s12 = sphi %s1080_s12, %s1320_s12  }
   0x4   : > { %s1103_s18 = sadd.s32 1, %s1055_s15   ;;  %s23_s19 = sadd.s32 1, %s1051_s14 }
   0x5   : > { %s20_s20 = ssub.s32 %s1055_s15, %s1103_s18  ;;  %p30_p0 = scmp.ne.s32.totalorder %s1051_s14, %s1047_s13 }
   0x6   : > { %p21_p1 = scmp.eq.s32.totalorder %s20_s20, 0  ;;  %p31_p2 = scmp.eq.s32.totalorder %s1055_s15, 0 }
   0x7   : > { %p102_p3 = scmp.eq.s32.totalorder %s816_s16, 1  ;;  %p107_p4 = scmp.ne.s32.totalorder %s1047_s13, %s1043_s12 }
   0x8   : > { %s1116_s21 = scalar_select %p21_p1, %s1051_s14, %s23_s19  }
   0x9   : > { %p32_p5 = por %p31_p2, %p30_p0  ;;  %p1118_p6 = por %p102_p3, %p30_p0 }
   0xa   : > { %p108_p7 = scmp.eq.s32.totalorder %s817_s17, 1  ;;  %p819_p9 = scmp.ge.s32.totalorder %s1055_s15, 2 }
   0xc   : > { %p1122_p8 = por %p108_p7, %p107_p4  ;;  %130 = sbr.rel (%p819_p9) target bundleno = 31 (0x1f), region = 24 }
  0x11   : > { %133 = sbr.rel (!%p32_p5) target bundleno = 31 (0x1f), region = 28  ;;  %s135_s24 = sand.u32 (%p32_p5), 1, %s1051_s14  }
  0x12   : > { %s952_s25 = smul.u32 (%p32_p5), 72, %s1055_s15 }
  0x13   : > { %s951_s26 = smul.u32 (%p32_p5), 144, %s135_s24 }
  0x14   : > { %s1134_s29 = scalar_lea.vmem (%p32_p5), %s1314_s0, %s952_s25 }
  0x15   : > { %v203_v0 = vld [vmem:[%s1134_s29] sm:$0xff] (%p32_p5)  ;;  %v205_v1 = vld [vmem:[%s1134_s29 + $0x8] sm:$0xff] (%p32_p5)  ;;  %v207_v2 = vld [vmem:[%s1134_s29 + $0x10] sm:$0xff] (%p32_p5)  ;;  %s1139_s30 = scalar_lea.vmem (%p32_p5), [#allocation2], %s951_s26 }
  0x16   : > { %204 = vst [vmem:[%s1139_s30] sm:$0xff] %v203_v0  ;;  %206 = vst [vmem:[%s1139_s30 + $0x8] sm:$0xff] %v205_v1  ;;  %v209_v3 = vld [vmem:[%s1134_s29 + $0x18] sm:$0xff]  ;;  %v211_v4 = vld [vmem:[%s1134_s29 + $0x20] sm:$0xff] }
  0x17   : > { %208 = vst [vmem:[%s1139_s30 + $0x10] sm:$0xff] %v207_v2  ;;  %v213_v5 = vld [vmem:[%s1134_s29 + $0x28] sm:$0xff]  ;;  %210 = vst [vmem:[%s1139_s30 + $0x18] sm:$0xff] %v209_v3  ;;  %v215_v6 = vld [vmem:[%s1134_s29 + $0x30] sm:$0xff] }
  0x18   : > { %212 = vst [vmem:[%s1139_s30 + $0x20] sm:$0xff] %v211_v4  ;;  %214 = vst [vmem:[%s1139_s30 + $0x28] sm:$0xff] %v213_v5  ;;  %v217_v7 = vld [vmem:[%s1134_s29 + $0x38] sm:$0xff]  ;;  %v219_v8 = vld [vmem:[%s1134_s29 + $0x40] sm:$0xff] }
  0x19   : > { %216 = vst [vmem:[%s1139_s30 + $0x30] sm:$0xff] %v215_v6  ;;  %218 = vst [vmem:[%s1139_s30 + $0x38] sm:$0xff] %v217_v7  ;;  %v221_v9 = vld [vmem:[%s1134_s29 + $0x90] sm:$0xff]  ;;  %v223_v10 = vld [vmem:[%s1134_s29 + $0x98] sm:$0xff] }
  0x1a   : > { %220 = vst [vmem:[%s1139_s30 + $0x40] sm:$0xff] %v219_v8  ;;  %v225_v11 = vld [vmem:[%s1134_s29 + $0xa0] sm:$0xff]  ;;  %222 = vst [vmem:[%s1139_s30 + $0x48] sm:$0xff] %v221_v9  ;;  %v227_v12 = vld [vmem:[%s1134_s29 + $0xa8] sm:$0xff] }
  0x1b   : > { %224 = vst [vmem:[%s1139_s30 + $0x50] sm:$0xff] %v223_v10  ;;  %226 = vst [vmem:[%s1139_s30 + $0x58] sm:$0xff] %v225_v11  ;;  %v229_v13 = vld [vmem:[%s1134_s29 + $0xb0] sm:$0xff]  ;;  %v231_v14 = vld [vmem:[%s1134_s29 + $0xb8] sm:$0xff] }
  0x1c   : > { %228 = vst [vmem:[%s1139_s30 + $0x60] sm:$0xff] %v227_v12  ;;  %230 = vst [vmem:[%s1139_s30 + $0x68] sm:$0xff] %v229_v13  ;;  %v233_v15 = vld [vmem:[%s1134_s29 + $0xc0] sm:$0xff]  ;;  %v235_v16 = vld [vmem:[%s1134_s29 + $0xc8] sm:$0xff] }
  0x1d   : > { %232 = vst [vmem:[%s1139_s30 + $0x70] sm:$0xff] %v231_v14  ;;  %v237_v17 = vld [vmem:[%s1134_s29 + $0xd0] sm:$0xff]  ;;  %234 = vst [vmem:[%s1139_s30 + $0x78] sm:$0xff] %v233_v15 }
  0x1e   : > { %236 = vst [vmem:[%s1139_s30 + $0x80] sm:$0xff] %v235_v16  ;;  %238 = vst [vmem:[%s1139_s30 + $0x88] sm:$0xff] %v237_v17 }
  0x1f PF: > { %p821_p10 = scmp.ge.s32.totalorder %s1055_s15, 1  ;;  %p243_p11 = scmp.lt.s32.totalorder %s1055_s15, 3 }
  0x21   : > { %p244_p12 = pnand %p821_p10, %p243_p11 }
  0x22   : > { %s1183_s8 = sand.u32 (!%p244_p12), 1, %s1047_s13   ;;  %s868_s5 = sshll.u32 (!%p244_p12), %s816_s16, 10 }
  0x23   : > { %247 = sbr.rel (%p244_p12) target bundleno = 282 (0x11a), region = 66  ;;  %s822_s28 = sshll.u32 (!%p244_p12), %s1183_s8, 6 }
  0x24   : > { %s953_s9 = smul.u32 (!%p244_p12), 144, %s1183_s8  ;;  %s1253_s4 = scalar_lea.vmem (!%p244_p12), [#allocation3], %s822_s28 }
  0x25   : > { %s749_s6 = sshll.u32 (!%p244_p12), %s1253_s4, 4  ;;  %s1267_s10 = scalar_lea.hbm (!%p244_p12), %s1317_s3, %s868_s5  ;;  %s1269_s6 = int_to_ptr.vmem [resolvable:$true] %s749_s6 }
  0x26   : > { %s1196_s20 = scalar_lea.vmem (!%p244_p12), [#allocation2], %s953_s9  ;;  %s736_s11 = scalar_lea.sflag (!%p244_p12), [#allocation4], %s1183_s8 }
  0x27   : > { %s995_s16 = scalar_lea.vmem (!%p244_p12), %s1269_s6, 1024  ;;  %s1057_s17 = smov (!%p244_p12), [#allocation3]  }
  0x28   : > { %v832_v18 = vld [vmem:[%s1315_s1 + $0x18] sm:$0xf]  ;;  %vm320_vm0 = vcmask 1043456   ;;  %v831_v19 = vld [vmem:[%s1315_s1 + $0x10] sm:$0xff]  ;;  %vm295_vm1 = vcmask 97280   ;;  %v281_v28 = vld [vmem:[%s1315_s1] sm:$0xff]  ;;  %p996_p13 = scmp.ne.s32.totalorder %s1269_s6, %s995_s16 }
  0x29   : > { %947 = vmatprep.subr.msk.mxu1 %vm320_vm0, %v832_v18  ;;  %899 = vmatprep.subr.msk.mxu0 %vm320_vm0, %v832_v18  ;;  %v282_v20 = vld [vmem:[%s1315_s1 + $0x8] sm:$0xf]  ;;  %v824_v24 = vld [vmem:[%s1196_s20 + $0x50] sm:$0xff]  ;;  %v826_v29 = vld [vmem:[%s1196_s20 + $0x60] sm:$0xff]  ;;  %s999_s19 = sshll.u32 %s1057_s17, 4  ;;  %s1000_s19 = int_to_ptr.vmem [resolvable:$false] %s999_s19 }
  0x2a   : > { %949 = vmatpush3.msk.msra.mxu1 %vm320_vm0, %v832_v18  ;;  %900 = vmatpush3.msk.msra.mxu0 %vm320_vm0, %v832_v18  ;;  %v852_v21 = vld [vmem:[%s1315_s1 + $0x28] sm:$0xf]  ;;  %v828_v25 = vld [vmem:[%s1196_s20 + $0x70] sm:$0xff]  ;;  %v830_v30 = vld [vmem:[%s1196_s20 + $0x80] sm:$0xff]  ;;  %p997_p0 = pnand %p996_p13, %p1118_p6  ;;  %p1002_p2 = scmp.lt.s32.totalorder %s1269_s6, %s1000_s19 }
  0x2b   : > { %948 = vmatprep.subr.mxu1 %v831_v19  ;;  %901 = vmatprep.subr.mxu0 %v831_v19  ;;  %v823_v22 = vld [vmem:[%s1196_s20 + $0x48] sm:$0xff]  ;;  %v825_v26 = vld [vmem:[%s1196_s20 + $0x58] sm:$0xff]  ;;  %v851_v31 = vld [vmem:[%s1315_s1 + $0x20] sm:$0xff] }
  0x2c   : > { %950 = vmatpush3.msra.mxu1 %v831_v19  ;;  %902 = vmatpush3.msra.mxu0 %v831_v19  ;;  %v827_v23 = vld [vmem:[%s1196_s20 + $0x68] sm:$0xff]  ;;  %v829_v27 = vld [vmem:[%s1196_s20 + $0x78] sm:$0xff]  ;;  %v273_v32 = vld [vmem:[%s1196_s20] sm:$0xff]  ;;  %p998_p1 = pneg %p997_p0 }
  0x2d   : > { %903 = vmatprep.mubr.msk.f32.mxu0 %vm295_vm1, %v823_v22  ;;  %909 = vmatprep.mubr.msk.f32.mxu1 %vm295_vm1, %v827_v23  ;;  %v561_v33 = vld [vmem:[%s1196_s20 + $0x8] sm:$0xff]  ;;  %v562_v34 = vld [vmem:[%s1196_s20 + $0x10] sm:$0xff]  ;;  %v563_v35 = vld [vmem:[%s1196_s20 + $0x18] sm:$0xff] }
  0x2e   : > { %915 = vmatprep.subr.msk.mxu1 %vm320_vm0, %v282_v20  ;;  %904 = vmatmul.mubr.msk.f32.vlgmr.msra.gmra.mxu0 %vm295_vm1, %v824_v24  ;;  %v564_v36 = vld [vmem:[%s1196_s20 + $0x20] sm:$0xff]  ;;  %v565_v37 = vld [vmem:[%s1196_s20 + $0x28] sm:$0xff]  ;;  %v566_v38 = vld [vmem:[%s1196_s20 + $0x30] sm:$0xff] }
  0x2f   : > { %910 = vmatmul.mubr.msk.f32.vlgmr.msra.gmra.mxu1 %vm295_vm1, %v828_v25  ;;  %931 = vmatprep.subr.msk.mxu0 %vm320_vm0, %v852_v21  ;;  %v567_v39 = vld [vmem:[%s1196_s20 + $0x38] sm:$0xff]  ;;  %v568_v40 = vld [vmem:[%s1196_s20 + $0x40] sm:$0xff]  ;;  %s1001_s20 = scalar_lea.vmem %s1000_s19, 2048 }
  0x30   : > { %916 = vmatpush3.msk.msra.mxu1 %vm320_vm0, %v282_v20  ;;  %932 = vmatpush3.msk.msra.mxu0 %vm320_vm0, %v852_v21  ;;  %v862_v53 = vld [vmem:[%s1316_s2] ss:$0 sm:$0xff]  ;;  %p1003_p3 = scmp.lt.s32.totalorder %s1001_s20, %s995_s16 }
  0x31   : > { %906 = vmatprep.mubr.msk.f32.mxu0 %vm295_vm1, %v825_v26  ;;  %912 = vmatprep.mubr.msk.f32.mxu1 %vm295_vm1, %v829_v27 }
  0x32   : > { %917 = vmatprep.subr.mxu1 %v281_v28  ;;  %907 = vmatmul.mubr.msk.f32.gmra.mxu0 %vm295_vm1, %v826_v29  ;;  %p1004_p4 = por %p1003_p3, %p1002_p2 }
  0x33   : > { %913 = vmatmul.mubr.msk.f32.gmra.mxu1 %vm295_vm1, %v830_v30  ;;  %933 = vmatprep.subr.mxu0 %v851_v31 }
  0x34   : > { %918 = vmatpush3.msra.mxu1 %v281_v28  ;;  %934 = vmatpush3.msra.mxu0 %v851_v31  ;;  %p1005_p5 = pnand %p1004_p4, %p998_p1 }
  0x35   : > { %919 = vmatprep.mubr.msk.f32.mxu1 %vm295_vm1, %v273_v32  ;;  %935 = vmatprep.mubr.msk.f32.mxu0 %vm295_vm1, %v561_v33 }
  0x36   : > { %936 = vmatmul.mubr.msk.f32.vlgmr.msra.gmra.mxu0 %vm295_vm1, %v562_v34 }
  0x37   : > { %920 = vmatmul.mubr.msk.f32.vlgmr.msra.gmra.mxu1 %vm295_vm1, %v561_v33  ;;  %938 = vmatprep.mubr.msk.f32.mxu0 %vm295_vm1, %v563_v35 }
  0x38   : > { %922 = vmatprep.mubr.msk.f32.mxu1 %vm295_vm1, %v562_v34 }
  0x3a   : > { %939 = vmatmul.mubr.msk.f32.gmra.mxu0 %vm295_vm1, %v564_v36 }
  0x3b   : > { %923 = vmatmul.mubr.msk.f32.gmra.mxu1 %vm295_vm1, %v563_v35  ;;  %941 = vmatprep.mubr.msk.f32.mxu0 %vm295_vm1, %v565_v37 }
  0x3c   : > { %925 = vmatprep.mubr.msk.f32.mxu1 %vm295_vm1, %v564_v36 }
  0x3e   : > { %942 = vmatmul.mubr.msk.f32.gmra.mxu0 %vm295_vm1, %v566_v38 }
  0x3f   : > { %926 = vmatmul.mubr.msk.f32.gmra.mxu1 %vm295_vm1, %v565_v37  ;;  %944 = vmatprep.mubr.msk.f32.mxu0 %vm295_vm1, %v567_v39 }
  0x40   : > { %928 = vmatprep.mubr.msk.f32.mxu1 %vm295_vm1, %v566_v38 }
  0x42   : > { %945 = vmatmul.mubr.msk.f32.gmra.mxu0 %vm295_vm1, %v568_v40 }
  0x43   : > { %929 = vmatmul.mubr.msk.f32.gmra.mxu1 %vm295_vm1, %v567_v39 }
  0xee   : > { %v905_v41 = vpop.f32.mrf.mxu0 }
  0xef   : > { %v911_v42 = vpop.f32.mrf.mxu1 }
  0xf0   : > { %v390_v43 = vpop.f32.mrf.mxu0 }
  0xf1   : > { %v410_v44 = vpop.f32.mrf.mxu1 }
  0xf2   : > { %v908_v45 = vpop.f32.mrf.mxu0 }
  0xf3   : > { %v914_v46 = vpop.f32.mrf.mxu1 }
  0xf4   : > { %v400_v47 = vpop.f32.mrf.mxu0 }
  0xf5   : > { %v420_v48 = vpop.f32.mrf.mxu1 }
  0xf6   : > { %v937_v49 = vpop.f32.mrf.mxu0 }
  0xf7   : > { %v921_v50 = vpop.f32.mrf.mxu1 }
  0xf8   : > { %v528_v51 = vadd.f32 %v921_v50, %v905_v41  ;;  %v665_v52 = vpop.f32.mrf.mxu0 }
  0xf9   : > { %v522_v54 = vpop.f32.mrf.mxu1 }
  0xfa   : > { %v705_v55 = vadd.f32 %v937_v49, %v528_v51  ;;  %v523_v56 = vadd.f32 %v522_v54, %v390_v43  ;;  %v940_v57 = vpop.f32.mrf.mxu0 }
  0xfb   : > { %v924_v58 = vpop.f32.mrf.mxu1 }
  0xfc   : > { %v720_v59 = vadd.f32 %v862_v53, %v705_v55  ;;  %v704_v60 = vadd.f32 %v665_v52, %v523_v56  ;;  %v538_v61 = vadd.f32 %v924_v58, %v908_v45  ;;  %v675_v62 = vpop.f32.mrf.mxu0 }
  0xfd   : > { %v532_v63 = vpop.f32.mrf.mxu1 }
  0xfe   : > { %728 = vst [vmem:[%s1253_s4 + $0x8] sm:$0xff] %v720_v59  ;;  %v719_v0 = vadd.f32 %v862_v53, %v704_v60  ;;  %v707_v1 = vadd.f32 %v940_v57, %v538_v61  ;;  %v533_v2 = vadd.f32 %v532_v63, %v400_v47  ;;  %v943_v3 = vpop.f32.mrf.mxu0 }
  0xff   : > { %v927_v4 = vpop.f32.mrf.mxu1 }
 0x100   : > { %727 = vst [vmem:[%s1253_s4] sm:$0xff] %v719_v0  ;;  %v722_v5 = vadd.f32 %v862_v53, %v707_v1  ;;  %v706_v6 = vadd.f32 %v675_v62, %v533_v2  ;;  %v548_v7 = vadd.f32 %v927_v4, %v911_v42  ;;  %v685_v8 = vpop.f32.mrf.mxu0 }
 0x101   : > { %v542_v9 = vpop.f32.mrf.mxu1 }
 0x102   : > { %730 = vst [vmem:[%s1253_s4 + $0x18] sm:$0xff] %v722_v5  ;;  %v721_v10 = vadd.f32 %v862_v53, %v706_v6  ;;  %v709_v11 = vadd.f32 %v943_v3, %v548_v7  ;;  %v543_v12 = vadd.f32 %v542_v9, %v410_v44  ;;  %v946_v14 = vpop.f32.mrf.mxu0 }
 0x103   : > { %v930_v13 = vpop.f32.mrf.mxu1 }
 0x104   : > { %729 = vst [vmem:[%s1253_s4 + $0x10] sm:$0xff] %v721_v10  ;;  %v724_v15 = vadd.f32 %v862_v53, %v709_v11  ;;  %v708_v16 = vadd.f32 %v685_v8, %v543_v12  ;;  %v558_v17 = vadd.f32 %v930_v13, %v914_v46  ;;  %v695_v22 = vpop.f32.mrf.mxu0 }
 0x105   : > { %v552_v18 = vpop.f32.mrf.mxu1 }
 0x106   : > { %732 = vst [vmem:[%s1253_s4 + $0x28] sm:$0xff] %v724_v15  ;;  %v723_v19 = vadd.f32 %v862_v53, %v708_v16  ;;  %v711_v20 = vadd.f32 %v946_v14, %v558_v17  ;;  %v553_v21 = vadd.f32 %v552_v18, %v420_v48 }
 0x108   : > { %731 = vst [vmem:[%s1253_s4 + $0x20] sm:$0xff] %v723_v19  ;;  %v726_v23 = vadd.f32 %v862_v53, %v711_v20  ;;  %v710_v24 = vadd.f32 %v695_v22, %v553_v21 }
 0x10a   : > { %734 = vst [vmem:[%s1253_s4 + $0x38] sm:$0xff] %v726_v23  ;;  %v725_v25 = vadd.f32 %v862_v53, %v710_v24 }
 0x10c   : > { %733 = vst [vmem:[%s1253_s4 + $0x30] sm:$0xff] %v725_v25 }
 0x10d   : > { %1008 = shalt.err (!%p1005_p5)
}
 0x10e   : > { %s1009_s24 = scalar_lea.hbm %s1267_s10, 1024  ;;  %s1013_s27 = scalar_lea.hbm %s1317_s3, 2048 }
 0x10f   : > { %p1010_p7 = scmp.ne.s32.totalorder %s1267_s10, %s1009_s24  ;;  %p1014_p12 = scmp.lt.s32.totalorder %s1267_s10, %s1317_s3 }
 0x110   : > { %p1015_p13 = scmp.lt.s32.totalorder %s1013_s27, %s1009_s24 }
 0x111   : > { %p1011_p10 = pnand %p1010_p7, %p1118_p6 }
 0x112   : > { %p1016_p0 = por %p1015_p13, %p1014_p12 }
 0x113   : > { %p1012_p11 = pneg %p1011_p10 }
 0x115   : > { %p1017_p1 = pnand %p1016_p0, %p1012_p11 }
 0x117   : > { %1020 = shalt.err (!%p1017_p1)
}
 0x118   : > { %s1058_s30 = smov 128   ;;  %s1059_s4 = smov 8  }
 0x119   : > { %954 = dma.vmem_to_hbm [thread:$0]  (%p1118_p6), %s1269_s6, 1024, %s1267_s10, %s736_s11, %s1058_s30, %s1058_s30, %s1059_s4  }
 0x11a PF: > { %s764_s5 = sand.u32 1, %s1043_s12   ;;  %p957_p2 = pnand %p819_p9, %p1122_p8 }
 0x11b   : > { %s765_s7 = scalar_lea.sflag [#allocation4], %s764_s5 }
 0x11c   : > { %p958_p3 = pneg %p957_p2 }
 0x11e   : > { %1038 = dma.done.wait (%p958_p3), %s765_s7, 1024  }
 0x11f   : > { %1040 = vsyncadd (%p958_p3), %s765_s7, 4294966272  ;;  %p13_p4 = scmp.ge.s32.totalorder %s1103_s18, 4   ;;  %s1320_s12 = smov %s1047_s13 }
 0x120   : > { %s1321_s13 = smov %s1051_s14  ;;  %s1322_s14 = smov %s1116_s21 }
 0x121   : > { %s1323_s15 = smov %s1103_s18  ;;  %15 = sbr.rel (!%p13_p4) target bundleno = 3 (0x3), region = 113 }
 0x126   :  { %770 = vsyncpa [#allocation4], 1 }
 0x127   :  { %772 = vsyncpa [#allocation4 + $0x1], 1 }

</bundles_post_ra>
